<compile_context>
chip_gen: v5e
topology: v5e:2x2
jax: 0.10.0
libtpu: 0.0.40
codegen_flags: <defaults>
</compile_context>

<pallas_src>
import jax
import jax.numpy as jnp
import numpy as np
from jax.experimental import pallas as pl
from jax.experimental.pallas import tpu as pltpu

MAX_LENGTH = 10
HP = 128           # padded lane width for every feature dim (H=32, L=10, V=64 -> 128)
HOFF = 64          # lane offset of the hidden state inside a 128-lane vector (needs H <= 64)
NEG = -1.0e30      # "minus infinity" padding for softmax / log-softmax bias lanes


# ---------------------------------------------------------------------------
# Kernel
# ---------------------------------------------------------------------------
# Activation lane layouts (all vectors are (1, HP) segments):
#   emb            : lanes [0:H)
#   hidden / newh  : lanes [HOFF:HOFF+H)         (pad lanes exactly 0)
#   attn weights   : lanes [0:L)
#   attn_applied,x : lanes [0:H)
#   GRU gates      : lanes [HOFF:HOFF+H) of each gate segment
#
# Weight slab (2*HP, 5*HP) bf16:
#   rows [0:HP)   stage-1, input = emb(lanes 0:H) + hid(lanes HOFF:HOFF+H):
#     cols [0:HP)      attn logits   (W_attn_e rows 0:H, W_attn_h rows HOFF:HOFF+H)
#     cols [HP:2HP)    combine(emb)  (W_comb_e rows 0:H)
#     cols [2HP:5HP)   GRU hidden gates r,z,n (W_h* rows HOFF:HOFF+H, out lanes at HOFF)
#   rows [HP:2HP) stage-2:
#     cols [0:HP)      W_comb_a (input attn_applied, rows 0:H)
#     cols [HP:4HP)    W_i{r,z,n} (input x, rows 0:H, out lanes at HOFF)
#     cols [4HP:5HP)   W_out (input newh, rows HOFF:HOFF+H)
#
# Bias slab (1, 7*HP) f32:
#   [0:HP) b_attn (-1e30 pad) | [HP:2HP) b_comb | [2HP:5HP) b_ir+b_hr, b_iz+b_hz, b_in
#   | [5HP:6HP) b_hn | [6HP:7HP) b_out (-1e30 pad)      (gate biases at lane offset HOFF)
#
# Output slab per step (1, 3*HP) f32: [log_probs | new_hidden | attn_weights]
def _attn_decoder_kernel(tok_ref, emb_ref, hid0_ref, enc_ref, w_ref, b_ref,
                         out_ref, hid_sc):
    del tok_ref  # token only drives the embedding-table index_map (row gather)
    f32 = jnp.float32
    bf16 = jnp.bfloat16

    # step 0: load the initial hidden state into the VMEM carry
    @pl.when(pl.program_id(0) == 0)
    def _():
        hid_sc[...] = hid0_ref[...]

    hid = hid_sc[...]                         # (1, HP) f32, valid lanes [HOFF:HOFF+H)
    emb = emb_ref[0].astype(f32)              # (1, HP) gathered row, valid lanes [0:H)
    b = b_ref[...]                            # (1, 7*HP) f32

    # ---- stage 1: one fused (1,HP)@(HP,5*HP) bf16 dot
    #      -> [attn logits | combine(emb) | GRU hidden gates r,z,n]
    x_cat = (emb + hid).astype(bf16)          # emb / hid occupy disjoint lanes
    y1 = jnp.dot(x_cat, w_ref[0:HP, :], preferred_element_type=f32)       # (1, 5*HP)

    attn_logits = y1[:, 0:HP] + b[:, 0:HP]    # pad lanes -> -1e30
    comb_emb = y1[:, HP:2 * HP]               # (1, HP)
    gates_h = y1[:, 2 * HP:5 * HP]            # (1, 3*HP), order r, z, n

    # ---- attention softmax (pad lanes exp-underflow to exactly 0)
    m = jnp.max(attn_logits, axis=-1, keepdims=True)
    e = jnp.exp(attn_logits - m)
    attw = e * pl.reciprocal(jnp.sum(e, axis=-1, keepdims=True), approx=False)

    # ---- attn_applied = attn_weights @ encoder_outputs
    attn_applied = jnp.dot(attw.astype(bf16), enc_ref[...],
                           preferred_element_type=f32)                    # (1, HP)

    # ---- attn_combine + relu
    x = (comb_emb
         + jnp.dot(attn_applied.astype(bf16), w_ref[HP:2 * HP, 0:HP],
                   preferred_element_type=f32)
         + b[:, HP:2 * HP])
    x = jnp.maximum(x, 0.0)                                                # (1, HP)

    # ---- GRU cell (PyTorch gate order r, z, n); input gates fused in one dot
    gates_x = (jnp.dot(x.astype(bf16), w_ref[HP:2 * HP, HP:4 * HP],
                       preferred_element_type=f32)
               + b[:, 2 * HP:5 * HP])                                      # (1, 3*HP)
    r = jax.nn.sigmoid(gates_x[:, 0:HP] + gates_h[:, 0:HP])
    z = jax.nn.sigmoid(gates_x[:, HP:2 * HP] + gates_h[:, HP:2 * HP])
    n = jnp.tanh(gates_x[:, 2 * HP:3 * HP]
                 + r * (gates_h[:, 2 * HP:3 * HP] + b[:, 5 * HP:6 * HP]))
    newh = (1.0 - z) * n + z * hid            # valid at [HOFF:HOFF+H), pads stay 0

    # ---- output projection + log_softmax
    logits = (jnp.dot(newh.astype(bf16), w_ref[HP:2 * HP, 4 * HP:5 * HP],
                      preferred_element_type=f32)
              + b[:, 6 * HP:7 * HP])          # pad lanes -> -1e30
    m2 = jnp.max(logits, axis=-1, keepdims=True)
    es = jnp.exp(logits - m2)
    lse = jnp.log(jnp.sum(es, axis=-1, keepdims=True)) + m2
    logp = logits - lse

    # carry hidden to the next step; write the lane-dense per-step output row
    hid_sc[...] = newh
    out_ref[0] = jnp.concatenate([logp, newh, attw], axis=1)               # (1, 3*HP)


# ---------------------------------------------------------------------------
# Host-side wrappers
# ---------------------------------------------------------------------------
def attn_decoder_decode(packed, tokens, hidden0, encoder_outputs):
    """Run T teacher-forced decoder steps in one pallas_call.

    tokens:           (T,) int32 decoder input word indices
    hidden0:          (1, 1, H) float32 initial hidden state
    encoder_outputs:  (L, H)   float32
    returns (log_probs (T, V), hiddens (T, 1, 1, H), attn_weights (T, L))
    """
    H, V, L = packed["H"], packed["V"], packed["L"]
    T = int(tokens.shape[0])

    tok = jnp.clip(jnp.asarray(tokens, jnp.int32), 0, V - 1)   # guard the row gather
    # per-SEQUENCE (not per-step) padding: hidden-native layout at lane HOFF
    hid0_p = jnp.zeros((1, HP), jnp.float32).at[:, HOFF:HOFF + H].set(
        hidden0.reshape(1, H).astype(jnp.float32))
    enc_p = jnp.zeros((HP, HP), jnp.bfloat16).at[:L, :H].set(
        encoder_outputs.astype(jnp.bfloat16))

    grid_spec = pltpu.PrefetchScalarGridSpec(
        num_scalar_prefetch=1,
        grid=(T,),
        in_specs=[
            # embedding table (V, 1, HP) bf16: gather row tok[i] each step
            pl.BlockSpec((1, 1, HP), lambda i, tok: (tok[i], 0, 0)),
            # constant blocks below: fetched once, VMEM-resident across all T steps
            pl.BlockSpec((1, HP), lambda i, tok: (0, 0)),                # initial hidden
            pl.BlockSpec((HP, HP), lambda i, tok: (0, 0)),               # encoder outputs
            pl.BlockSpec((2 * HP, 5 * HP), lambda i, tok: (0, 0)),       # bf16 weight slab
            pl.BlockSpec((1, 7 * HP), lambda i, tok: (0, 0)),            # f32 bias slab
        ],
        out_specs=pl.BlockSpec((1, 1, 3 * HP), lambda i, tok: (i, 0, 0)),
        scratch_shapes=[pltpu.VMEM((1, HP), jnp.float32)],               # hidden carry
    )

    out = pl.pallas_call(
        _attn_decoder_kernel,
        out_shape=jax.ShapeDtypeStruct((T, 1, 3 * HP), jnp.float32),
        grid_spec=grid_spec,
        compiler_params=pltpu.CompilerParams(dimension_semantics=("arbitrary",)),
    )(tok, packed["emb"], hid0_p, enc_p, packed["w"], packed["b"])

    out = out.reshape(T, 3 * HP)
    logp = out[:, 0:V]
    hiddens = out[:, HP + HOFF:HP + HOFF + H].reshape(T, 1, 1, H)
    attw = out[:, 2 * HP:2 * HP + L]
    return logp, hiddens, attw


def attn_decoder_forward(packed, input_token, hidden, encoder_outputs):
    """Single decoder step (original module forward signature)."""
    tokens = jnp.asarray(input_token, jnp.int32).reshape(1)
    logp, hiddens, attw = attn_decoder_decode(packed, tokens, hidden, encoder_outputs)
    return logp, hiddens[0], attw


# ---------------------------------------------------------------------------
# Parameters: logical (PyTorch-like) params + one-time packing into slabs
# ---------------------------------------------------------------------------
def init_params(key, hidden_size, output_size, max_length=MAX_LENGTH):
    H, V, L = hidden_size, output_size, max_length
    keys = jax.random.split(key, 16)
    s = 0.1

    def rnd(k, shape):
        return (s * jax.random.normal(k, shape)).astype(jnp.float32)

    # nn.Linear(in, out) stores W as (out, in); we keep (in, out) = W.T for x @ W.
    W_attn = rnd(keys[0], (2 * H, L))      # attn:         (2H -> L)
    W_comb = rnd(keys[1], (2 * H, H))      # attn_combine: (2H -> H)
    W_ih = rnd(keys[2], (H, 3 * H))        # GRU input weights (gates r, z, n)
    W_hh = rnd(keys[3], (H, 3 * H))        # GRU hidden weights

    return {
        "hidden_size": H, "output_size": V, "max_length": L,
        "embedding": rnd(keys[4], (V, H)),              # nn.Embedding(output_size, hidden_size)
        "W_attn_e": W_attn[:H], "W_attn_h": W_attn[H:],
        "b_attn": rnd(keys[5], (1, L)),
        "W_comb_e": W_comb[:H], "W_comb_a": W_comb[H:],
        "b_comb": rnd(keys[6], (1, H)),
        "W_ir": W_ih[:, 0:H], "W_iz": W_ih[:, H:2 * H], "W_in": W_ih[:, 2 * H:3 * H],
        "W_hr": W_hh[:, 0:H], "W_hz": W_hh[:, H:2 * H], "W_hn": W_hh[:, 2 * H:3 * H],
        "b_ir": rnd(keys[7], (1, H)), "b_iz": rnd(keys[8], (1, H)), "b_in": rnd(keys[9], (1, H)),
        "b_hr": rnd(keys[10], (1, H)), "b_hz": rnd(keys[11], (1, H)), "b_hn": rnd(keys[12], (1, H)),
        "W_out": rnd(keys[13], (H, V)),
        "b_out": rnd(keys[14], (1, V)),
    }


def pack_params(p):
    """One-time packing of logical params into tile-aligned kernel slabs."""
    H, V, L = p["hidden_size"], p["output_size"], p["max_length"]
    assert H <= HOFF and V <= HP and L <= HP

    # embedding table, lane-padded bf16, singleton middle dim so the gathered
    # (1, 1, HP) block has legal last-two dims.
    emb = (jnp.zeros((V, 1, HP), jnp.float32).at[:, 0, :H]
           .set(p["embedding"])).astype(jnp.bfloat16)

    # weight slab (2*HP, 5*HP) bf16; pad entries are exactly zero.
    w = jnp.zeros((2 * HP, 5 * HP), jnp.float32)
    # stage 1 (input lanes: emb at [0:H), hid at [HOFF:HOFF+H))
    w = w.at[0:H, 0:L].set(p["W_attn_e"])
    w = w.at[HOFF:HOFF + H, 0:L].set(p["W_attn_h"])
    w = w.at[0:H, HP:HP + H].set(p["W_comb_e"])
    w = w.at[HOFF:HOFF + H, 2 * HP + HOFF:2 * HP + HOFF + H].set(p["W_hr"])
    w = w.at[HOFF:HOFF + H, 3 * HP + HOFF:3 * HP + HOFF + H].set(p["W_hz"])
    w = w.at[HOFF:HOFF + H, 4 * HP + HOFF:4 * HP + HOFF + H].set(p["W_hn"])
    # stage 2
    w = w.at[HP:HP + H, 0:H].set(p["W_comb_a"])
    w = w.at[HP:HP + H, HP + HOFF:HP + HOFF + H].set(p["W_ir"])
    w = w.at[HP:HP + H, 2 * HP + HOFF:2 * HP + HOFF + H].set(p["W_iz"])
    w = w.at[HP:HP + H, 3 * HP + HOFF:3 * HP + HOFF + H].set(p["W_in"])
    w = w.at[HP + HOFF:HP + HOFF + H, 4 * HP:4 * HP + V].set(p["W_out"])
    w = w.astype(jnp.bfloat16)

    # bias slab (1, 7*HP) f32; softmax segments padded with -1e30, others with 0.
    b = jnp.zeros((1, 7 * HP), jnp.float32)
    b = b.at[:, 0:HP].set(NEG)
    b = b.at[:, 0:L].set(p["b_attn"])
    b = b.at[:, HP:HP + H].set(p["b_comb"])
    b = b.at[:, 2 * HP + HOFF:2 * HP + HOFF + H].set(p["b_ir"] + p["b_hr"])
    b = b.at[:, 3 * HP + HOFF:3 * HP + HOFF + H].set(p["b_iz"] + p["b_hz"])
    b = b.at[:, 4 * HP + HOFF:4 * HP + HOFF + H].set(p["b_in"])
    b = b.at[:, 5 * HP + HOFF:5 * HP + HOFF + H].set(p["b_hn"])
    b = b.at[:, 6 * HP:7 * HP].set(NEG)
    b = b.at[:, 6 * HP:6 * HP + V].set(p["b_out"])

    return {"emb": emb, "w": w, "b": b, "H": H, "V": V, "L": L}


# ---------------------------------------------------------------------------
# Pure-JAX reference mirroring the PyTorch forward (f32, single step)
# ---------------------------------------------------------------------------
def reference_forward(params, input_token, hidden, encoder_outputs):
    H = params["hidden_size"]
    emb = params["embedding"][input_token].reshape(1, H)
    hid = hidden.reshape(1, H)
    cat1 = jnp.concatenate([emb, hid], axis=1)
    W_attn = jnp.concatenate([params["W_attn_e"], params["W_attn_h"]], axis=0)
    attw = jax.nn.softmax(cat1 @ W_attn + params["b_attn"], axis=1)
    attn_applied = attw @ encoder_outputs
    cat2 = jnp.concatenate([emb, attn_applied], axis=1)
    W_comb = jnp.concatenate([params["W_comb_e"], params["W_comb_a"]], axis=0)
    x = jax.nn.relu(cat2 @ W_comb + params["b_comb"])
    r = jax.nn.sigmoid(x @ params["W_ir"] + params["b_ir"] + hid @ params["W_hr"] + params["b_hr"])
    z = jax.nn.sigmoid(x @ params["W_iz"] + params["b_iz"] + hid @ params["W_hz"] + params["b_hz"])
    n = jnp.tanh(x @ params["W_in"] + params["b_in"] + r * (hid @ params["W_hn"] + params["b_hn"]))
    newh = (1.0 - z) * n + z * hid
    logits = newh @ params["W_out"] + params["b_out"]
    logp = jax.nn.log_softmax(logits, axis=1)
    return logp, newh.reshape(1, 1, H), attw


if __name__ == "__main__":
    HIDDEN = 32
    OUTPUT = 64
    L = MAX_LENGTH
    T = 6                                    # decode steps fused into one kernel call

    key = jax.random.PRNGKey(0)
    kp, kh, ke, kt = jax.random.split(key, 4)

    params = init_params(kp, HIDDEN, OUTPUT, L)
    packed = pack_params(params)

    tokens = jax.random.randint(kt, (T,), 0, OUTPUT, dtype=jnp.int32)
    hidden0 = jax.random.normal(kh, (1, 1, HIDDEN), jnp.float32)
    encoder_outputs = jax.random.normal(ke, (L, HIDDEN), jnp.float32)

    # ---- multi-step decode (weights stay VMEM-resident across all T steps)
    logp, hiddens, attws = attn_decoder_decode(packed, tokens, hidden0, encoder_outputs)
    jax.block_until_ready((logp, hiddens, attws))

    # per-step check vs pure-JAX f32 reference (bf16 weights -> loosened tolerance)
    TOL = dict(rtol=2e-2, atol=2e-2)
    h = hidden0
    for t in range(T):
        ref_logp, h, ref_w = reference_forward(params, tokens[t], h, encoder_outputs)
        np.testing.assert_allclose(np.asarray(logp[t]), np.asarray(ref_logp[0]), **TOL)
        np.testing.assert_allclose(np.asarray(hiddens[t]).reshape(-1),
                                   np.asarray(h).reshape(-1), **TOL)
        np.testing.assert_allclose(np.asarray(attws[t]), np.asarray(ref_w[0]), **TOL)

    # ---- single-step API (original module forward signature)
    s_logp, s_h, s_w = attn_decoder_forward(packed, tokens[0], hidden0, encoder_outputs)
    jax.block_until_ready((s_logp, s_h, s_w))
    ref_logp, ref_h, ref_w = reference_forward(params, tokens[0], hidden0, encoder_outputs)
    np.testing.assert_allclose(np.asarray(s_logp), np.asarray(ref_logp), **TOL)
    np.testing.assert_allclose(np.asarray(s_h), np.asarray(ref_h), **TOL)
    np.testing.assert_allclose(np.asarray(s_w), np.asarray(ref_w), **TOL)

    print("KERNEL_OK")
</pallas_src>

<mosaic_0001>
module attributes {stable_mosaic.version = 11 : i64} {
  func.func @_attn_decoder_kernel(%arg0: i32, %arg1: memref<6xi32, #tpu.memory_space<smem>>, %arg2: memref<1x1x128xbf16, #tpu.memory_space<vmem>>, %arg3: memref<1x128xf32, #tpu.memory_space<vmem>>, %arg4: memref<128x128xbf16, #tpu.memory_space<vmem>>, %arg5: memref<256x640xbf16, #tpu.memory_space<vmem>>, %arg6: memref<1x896xf32, #tpu.memory_space<vmem>>, %arg7: memref<1x1x384xf32, #tpu.memory_space<vmem>>, %arg8: memref<1x128xf32, #tpu.memory_space<vmem>>) attributes {dimension_semantics = [#tpu.dimension_semantics<arbitrary>], iteration_bounds = array<i64: 6>, scalar_prefetch = 1 : i64, scratch_operands = 1 : i64, tpu.core_type = #tpu.core_type<tc>, window_params = [{transform_indices = @transform_0, window_bounds = array<i64: 1, 1, 128>}, {pipeline_mode = #tpu.pipeline_mode<synchronous>, transform_indices = @transform_1, window_bounds = array<i64: 1, 128>}, {pipeline_mode = #tpu.pipeline_mode<synchronous>, transform_indices = @transform_2, window_bounds = array<i64: 128, 128>}, {pipeline_mode = #tpu.pipeline_mode<synchronous>, transform_indices = @transform_3, window_bounds = array<i64: 256, 640>}, {pipeline_mode = #tpu.pipeline_mode<synchronous>, transform_indices = @transform_4, window_bounds = array<i64: 1, 896>}, {transform_indices = @transform_5, window_bounds = array<i64: 1, 1, 384>}]} {
    %c0_i32 = arith.constant 0 : i32
    %0 = arith.cmpi eq, %arg0, %c0_i32 : i32
    %1 = arith.extui %0 : i1 to i32
    %c0_i32_0 = arith.constant 0 : i32
    %2 = arith.cmpi ne, %1, %c0_i32_0 : i32
    scf.if %2 {
      %c0_32 = arith.constant 0 : index
      %c0_33 = arith.constant 0 : index
      %92 = vector.load %arg3[%c0_32, %c0_33] : memref<1x128xf32, #tpu.memory_space<vmem>>, vector<1x128xf32>
      %c0_34 = arith.constant 0 : index
      %c0_35 = arith.constant 0 : index
      %93 = vector.load %arg8[%c0_34, %c0_35] : memref<1x128xf32, #tpu.memory_space<vmem>>, vector<1x128xf32>
      tpu.vector_store %arg8[%c0_34, %c0_35], %92 {strides = array<i32>} : memref<1x128xf32, #tpu.memory_space<vmem>>, vector<1x128xf32>,
    } else {
    }
    %c0 = arith.constant 0 : index
    %c0_1 = arith.constant 0 : index
    %3 = vector.load %arg8[%c0, %c0_1] : memref<1x128xf32, #tpu.memory_space<vmem>>, vector<1x128xf32>
    %c0_2 = arith.constant 0 : index
    %c0_3 = arith.constant 0 : index
    %c0_4 = arith.constant 0 : index
    %4 = vector.load %arg2[%c0_2, %c0_3, %c0_4] : memref<1x1x128xbf16, #tpu.memory_space<vmem>>, vector<1x1x128xbf16>
    %5 = vector.shape_cast %4 : vector<1x1x128xbf16> to vector<1x128xbf16>
    %6 = arith.extf %5 : vector<1x128xbf16> to vector<1x128xf32>
    %c0_5 = arith.constant 0 : index
    %c0_6 = arith.constant 0 : index
    %7 = vector.load %arg6[%c0_5, %c0_6] : memref<1x896xf32, #tpu.memory_space<vmem>>, vector<1x896xf32>
    %8 = arith.addf %6, %3 : vector<1x128xf32>
    %9 = arith.truncf %8 : vector<1x128xf32> to vector<1x128xbf16>
    %c0_7 = arith.constant 0 : index
    %c0_8 = arith.constant 0 : index
    %10 = vector.load %arg5[%c0_7, %c0_8] : memref<256x640xbf16, #tpu.memory_space<vmem>>, vector<128x640xbf16>
    %cst = arith.constant dense<0.000000e+00> : vector<1x640xf32>
    %11 = tpu.matmul %9, %10, %cst {dimension_numbers = #tpu.dot_dimension_numbers<[1], [0], [0], [1], [0, 0, 1, 1], [], []>} : vector<1x128xbf16>, vector<128x640xbf16>, vector<1x640xf32> -> vector<1x640xf32>
    %12 = vector.extract_strided_slice %11 {offsets = [0, 0], sizes = [1, 128], strides = [1, 1]} : vector<1x640xf32> to vector<1x128xf32>
    %13 = vector.extract_strided_slice %7 {offsets = [0, 0], sizes = [1, 128], strides = [1, 1]} : vector<1x896xf32> to vector<1x128xf32>
    %14 = arith.addf %12, %13 : vector<1x128xf32>
    %15 = vector.extract_strided_slice %11 {offsets = [0, 128], sizes = [1, 128], strides = [1, 1]} : vector<1x640xf32> to vector<1x128xf32>
    %16 = vector.extract_strided_slice %11 {offsets = [0, 256], sizes = [1, 384], strides = [1, 1]} : vector<1x640xf32> to vector<1x384xf32>
    %cst_9 = arith.constant dense<0xFF800000> : vector<1xf32>
    %17 = vector.multi_reduction <maximumf>, %14, %cst_9 [1] : vector<1x128xf32> to vector<1xf32>
    %18 = vector.shape_cast %17 : vector<1xf32> to vector<1x1xf32>
    %19 = vector.broadcast %18 : vector<1x1xf32> to vector<1x128xf32>
    %20 = arith.subf %14, %19 : vector<1x128xf32>
    %21 = math.exp %20 : vector<1x128xf32>
    %cst_10 = arith.constant dense<0.000000e+00> : vector<1xf32>
    %22 = vector.multi_reduction <add>, %21, %cst_10 [1] : vector<1x128xf32> to vector<1xf32>
    %23 = vector.shape_cast %22 : vector<1xf32> to vector<1x1xf32>
    %24 = tpu.reciprocal %23 : vector<1x1xf32> -> vector<1x1xf32>
    %25 = vector.broadcast %24 : vector<1x1xf32> to vector<1x128xf32>
    %26 = arith.mulf %21, %25 : vector<1x128xf32>
    %27 = arith.truncf %26 : vector<1x128xf32> to vector<1x128xbf16>
    %c0_11 = arith.constant 0 : index
    %c0_12 = arith.constant 0 : index
    %28 = vector.load %arg4[%c0_11, %c0_12] : memref<128x128xbf16, #tpu.memory_space<vmem>>, vector<128x128xbf16>
    %cst_13 = arith.constant dense<0.000000e+00> : vector<1x128xf32>
    %29 = tpu.matmul %27, %28, %cst_13 {dimension_numbers = #tpu.dot_dimension_numbers<[1], [0], [0], [1], [0, 0, 1, 1], [], []>} : vector<1x128xbf16>, vector<128x128xbf16>, vector<1x128xf32> -> vector<1x128xf32>
    %30 = arith.truncf %29 : vector<1x128xf32> to vector<1x128xbf16>
    %c128 = arith.constant 128 : index
    %c0_14 = arith.constant 0 : index
    %31 = vector.load %arg5[%c128, %c0_14] : memref<256x640xbf16, #tpu.memory_space<vmem>>, vector<128x128xbf16>
    %cst_15 = arith.constant dense<0.000000e+00> : vector<1x128xf32>
    %32 = tpu.matmul %30, %31, %cst_15 {dimension_numbers = #tpu.dot_dimension_numbers<[1], [0], [0], [1], [0, 0, 1, 1], [], []>} : vector<1x128xbf16>, vector<128x128xbf16>, vector<1x128xf32> -> vector<1x128xf32>
    %33 = arith.addf %15, %32 : vector<1x128xf32>
    %34 = vector.extract_strided_slice %7 {offsets = [0, 128], sizes = [1, 128], strides = [1, 1]} : vector<1x896xf32> to vector<1x128xf32>
    %35 = arith.addf %33, %34 : vector<1x128xf32>
    %cst_16 = arith.constant 0.000000e+00 : f32
    %36 = vector.broadcast %cst_16 : f32 to vector<1x128xf32>
    %37 = arith.maximumf %35, %36 : vector<1x128xf32>
    %38 = arith.truncf %37 : vector<1x128xf32> to vector<1x128xbf16>
    %c128_17 = arith.constant 128 : index
    %c128_18 = arith.constant 128 : index
    %39 = vector.load %arg5[%c128_17, %c128_18] : memref<256x640xbf16, #tpu.memory_space<vmem>>, vector<128x384xbf16>
    %cst_19 = arith.constant dense<0.000000e+00> : vector<1x384xf32>
    %40 = tpu.matmul %38, %39, %cst_19 {dimension_numbers = #tpu.dot_dimension_numbers<[1], [0], [0], [1], [0, 0, 1, 1], [], []>} : vector<1x128xbf16>, vector<128x384xbf16>, vector<1x384xf32> -> vector<1x384xf32>
    %41 = vector.extract_strided_slice %7 {offsets = [0, 256], sizes = [1, 384], strides = [1, 1]} : vector<1x896xf32> to vector<1x384xf32>
    %42 = arith.addf %40, %41 : vector<1x384xf32>
    %43 = vector.extract_strided_slice %42 {offsets = [0, 0], sizes = [1, 128], strides = [1, 1]} : vector<1x384xf32> to vector<1x128xf32>
    %44 = vector.extract_strided_slice %16 {offsets = [0, 0], sizes = [1, 128], strides = [1, 1]} : vector<1x384xf32> to vector<1x128xf32>
    %45 = arith.addf %43, %44 : vector<1x128xf32>
    %46 = arith.negf %45 : vector<1x128xf32>
    %47 = math.exp %46 : vector<1x128xf32>
    %cst_20 = arith.constant 1.000000e+00 : f32
    %48 = vector.broadcast %cst_20 : f32 to vector<1x128xf32>
    %49 = arith.addf %48, %47 : vector<1x128xf32>
    %50 = arith.divf %48, %49 : vector<1x128xf32>
    %51 = vector.extract_strided_slice %42 {offsets = [0, 128], sizes = [1, 128], strides = [1, 1]} : vector<1x384xf32> to vector<1x128xf32>
    %52 = vector.extract_strided_slice %16 {offsets = [0, 128], sizes = [1, 128], strides = [1, 1]} : vector<1x384xf32> to vector<1x128xf32>
    %53 = arith.addf %51, %52 : vector<1x128xf32>
    %54 = arith.negf %53 : vector<1x128xf32>
    %55 = math.exp %54 : vector<1x128xf32>
    %cst_21 = arith.constant 1.000000e+00 : f32
    %56 = vector.broadcast %cst_21 : f32 to vector<1x128xf32>
    %57 = arith.addf %56, %55 : vector<1x128xf32>
    %58 = arith.divf %56, %57 : vector<1x128xf32>
    %59 = vector.extract_strided_slice %42 {offsets = [0, 256], sizes = [1, 128], strides = [1, 1]} : vector<1x384xf32> to vector<1x128xf32>
    %60 = vector.extract_strided_slice %16 {offsets = [0, 256], sizes = [1, 128], strides = [1, 1]} : vector<1x384xf32> to vector<1x128xf32>
    %61 = vector.extract_strided_slice %7 {offsets = [0, 640], sizes = [1, 128], strides = [1, 1]} : vector<1x896xf32> to vector<1x128xf32>
    %62 = arith.addf %60, %61 : vector<1x128xf32>
    %63 = arith.mulf %50, %62 : vector<1x128xf32>
    %64 = arith.addf %59, %63 : vector<1x128xf32>
    %65 = math.tanh %64 : vector<1x128xf32>
    %cst_22 = arith.constant 1.000000e+00 : f32
    %66 = vector.broadcast %cst_22 : f32 to vector<1x128xf32>
    %67 = arith.subf %66, %58 : vector<1x128xf32>
    %68 = arith.mulf %67, %65 : vector<1x128xf32>
    %69 = arith.mulf %58, %3 : vector<1x128xf32>
    %70 = arith.addf %68, %69 : vector<1x128xf32>
    %71 = arith.truncf %70 : vector<1x128xf32> to vector<1x128xbf16>
    %c128_23 = arith.constant 128 : index
    %c512 = arith.constant 512 : index
    %72 = vector.load %arg5[%c128_23, %c512] : memref<256x640xbf16, #tpu.memory_space<vmem>>, vector<128x128xbf16>
    %cst_24 = arith.constant dense<0.000000e+00> : vector<1x128xf32>
    %73 = tpu.matmul %71, %72, %cst_24 {dimension_numbers = #tpu.dot_dimension_numbers<[1], [0], [0], [1], [0, 0, 1, 1], [], []>} : vector<1x128xbf16>, vector<128x128xbf16>, vector<1x128xf32> -> vector<1x128xf32>
    %74 = vector.extract_strided_slice %7 {offsets = [0, 768], sizes = [1, 128], strides = [1, 1]} : vector<1x896xf32> to vector<1x128xf32>
    %75 = arith.addf %73, %74 : vector<1x128xf32>
    %cst_25 = arith.constant dense<0xFF800000> : vector<1xf32>
    %76 = vector.multi_reduction <maximumf>, %75, %cst_25 [1] : vector<1x128xf32> to vector<1xf32>
    %77 = vector.shape_cast %76 : vector<1xf32> to vector<1x1xf32>
    %78 = vector.broadcast %77 : vector<1x1xf32> to vector<1x128xf32>
    %79 = arith.subf %75, %78 : vector<1x128xf32>
    %80 = math.exp %79 : vector<1x128xf32>
    %cst_26 = arith.constant dense<0.000000e+00> : vector<1xf32>
    %81 = vector.multi_reduction <add>, %80, %cst_26 [1] : vector<1x128xf32> to vector<1xf32>
    %82 = vector.shape_cast %81 : vector<1xf32> to vector<1x1xf32>
    %83 = math.log %82 : vector<1x1xf32>
    %84 = arith.addf %83, %77 : vector<1x1xf32>
    %85 = vector.broadcast %84 : vector<1x1xf32> to vector<1x128xf32>
    %86 = arith.subf %75, %85 : vector<1x128xf32>
    %c0_27 = arith.constant 0 : index
    %c0_28 = arith.constant 0 : index
    %87 = vector.load %arg8[%c0_27, %c0_28] : memref<1x128xf32, #tpu.memory_space<vmem>>, vector<1x128xf32>
    tpu.vector_store %arg8[%c0_27, %c0_28], %70 {strides = array<i32>} : memref<1x128xf32, #tpu.memory_space<vmem>>, vector<1x128xf32>,
    %88 = tpu.concatenate %86, %70, %26 in 1 : vector<1x128xf32>, vector<1x128xf32>, vector<1x128xf32> -> vector<1x384xf32>
    %c0_29 = arith.constant 0 : index
    %c0_30 = arith.constant 0 : index
    %c0_31 = arith.constant 0 : index
    %89 = vector.load %arg7[%c0_29, %c0_30, %c0_31] : memref<1x1x384xf32, #tpu.memory_space<vmem>>, vector<1x1x384xf32>
    %90 = vector.shape_cast %89 : vector<1x1x384xf32> to vector<1x384xf32>
    %91 = vector.shape_cast %88 : vector<1x384xf32> to vector<1x1x384xf32>
    tpu.vector_store %arg7[%c0_29, %c0_30, %c0_31], %91 {strides = array<i32>} : memref<1x1x384xf32, #tpu.memory_space<vmem>>, vector<1x1x384xf32>,
    return
  }
  func.func @transform_0(%arg0: i32, %arg1: memref<6xi32, #tpu.memory_space<smem>>) -> (i32, i32, i32) {
    %0 = arith.index_cast %arg0 : i32 to index
    %1 = memref.load %arg1[%0] : memref<6xi32, #tpu.memory_space<smem>>
    %c0_i32 = arith.constant 0 : i32
    %c0_i32_0 = arith.constant 0 : i32
    %c0_i32_1 = arith.constant 0 : i32
    return %1, %c0_i32, %c0_i32_0 : i32, i32, i32
  }
  func.func @transform_1(%arg0: i32, %arg1: memref<6xi32, #tpu.memory_space<smem>>) -> (i32, i32) {
    %c0_i32 = arith.constant 0 : i32
    %c0_i32_0 = arith.constant 0 : i32
    %c0_i32_1 = arith.constant 0 : i32
    return %c0_i32, %c0_i32_0 : i32, i32
  }
  func.func @transform_2(%arg0: i32, %arg1: memref<6xi32, #tpu.memory_space<smem>>) -> (i32, i32) {
    %c0_i32 = arith.constant 0 : i32
    %c0_i32_0 = arith.constant 0 : i32
    %c0_i32_1 = arith.constant 0 : i32
    return %c0_i32, %c0_i32_0 : i32, i32
  }
  func.func @transform_3(%arg0: i32, %arg1: memref<6xi32, #tpu.memory_space<smem>>) -> (i32, i32) {
    %c0_i32 = arith.constant 0 : i32
    %c0_i32_0 = arith.constant 0 : i32
    %c0_i32_1 = arith.constant 0 : i32
    return %c0_i32, %c0_i32_0 : i32, i32
  }
  func.func @transform_4(%arg0: i32, %arg1: memref<6xi32, #tpu.memory_space<smem>>) -> (i32, i32) {
    %c0_i32 = arith.constant 0 : i32
    %c0_i32_0 = arith.constant 0 : i32
    %c0_i32_1 = arith.constant 0 : i32
    return %c0_i32, %c0_i32_0 : i32, i32
  }
  func.func @transform_5(%arg0: i32, %arg1: memref<6xi32, #tpu.memory_space<smem>>) -> (i32, i32, i32) {
    %c0_i32 = arith.constant 0 : i32
    %c0_i32_0 = arith.constant 0 : i32
    %c0_i32_1 = arith.constant 0 : i32
    return %arg0, %c0_i32, %c0_i32_0 : i32, i32, i32
  }
}

</mosaic_0001>

<bundles_post_ra>
// kernel: tpu_custom_call.1
= control target key start
LH: loop header
LB: loop body
LE: loop exit
PB: predicated region body
PF: predicated region fallthrough
CT: control target
= control target key end

     0   :  { %s1855_s24 = smov [#allocation4]   ;;  %s2084_s0 = inlined_call_operand.vmem [shape: s32[6], index: 0, kind: input, shape index: {}]   ;;  %s2085_s1 = inlined_call_operand.vmem [shape: bf16[64,1,128], index: 1, kind: input, shape index: {}]   ;;  %s2086_s2 = inlined_call_operand.vmem [shape: f32[1,128], index: 2, kind: input, shape index: {}]   ;;  %s2087_s3 = inlined_call_operand.vmem [shape: bf16[128,128], index: 3, kind: input, shape index: {}]   ;;  %s2088_s4 = inlined_call_operand.hbm [shape: bf16[256,640], index: 4, kind: input, shape index: {}]   ;;  %s2089_s5 = inlined_call_operand.vmem [shape: f32[1,896], index: 5, kind: input, shape index: {}]   ;;  %s2090_s6 = inlined_call_operand.hbm [shape: f32[6,1,384], index: 6, kind: output, shape index: {}]  }
   0x1   :  { %s12_s23 = sshll.u32 %s2084_s0, 4  ;;  %s13_s23 = int_to_ptr.vmem [resolvable:$true] %s12_s23 }
   0x2   :  { %15 = dma.vmem_to_smem %s13_s23, 16, %s1855_s24, [#allocation3] }
   0x3   :  { %1829 = dma.done.wait [#allocation3], 16 }
   0x4   :  { %1830 = vsyncadd [#allocation3], 4294967280 }
   0x5   :  { %18 = sfence }
   0x6   :  { %19 = vsyncpa [#allocation6], 0 }
   0x7   :  { %20 = vsyncpa [#allocation7], 0 }
   0x8   :  { %22 = vsyncpa [#allocation7 + $0x1], 0  ;;  %s1897_s25 = smov 0   ;;  %s1899_s26 = smov 0  }
   0x9   :  { %s1901_s27 = smov 0   ;;  %s1903_s28 = smov 0  }
   0xa LB: > { %s1918_s0 = sadd.s32 4294967295, %s1853_s28   ;;  %s1219_s29 = sadd.s32 4294967294, %s1853_s28   ;;  %s1853_s28 = sphi %s1903_s28, %s2096_s28   ;;  %s1849_s27 = sphi %s1901_s27, %s2095_s27   ;;  %s1845_s26 = sphi %s1899_s26, %s2094_s26   ;;  %s1841_s25 = sphi %s1897_s25, %s2093_s25  }
   0xb   : > { %s1922_s30 = sadd.s32 1, %s1853_s28   ;;  %s147_s7 = sadd.s32 1, %s1849_s27 }
   0xc   : > { %s144_s8 = ssub.s32 %s1853_s28, %s1922_s30  ;;  %p157_p0 = scmp.ne.s32.totalorder %s1849_s27, %s1845_s26 }
   0xd   : > { %p145_p1 = scmp.eq.s32.totalorder %s144_s8, 0  ;;  %p158_p2 = scmp.eq.s32.totalorder %s1918_s0, 5 }
   0xe   : > { %p163_p3 = scmp.ne.s32.totalorder %s1845_s26, %s1841_s25  ;;  %p164_p4 = scmp.eq.s32.totalorder %s1219_s29, 5 }
   0xf   : > { %s1933_s9 = scalar_select %p145_p1, %s1849_s27, %s147_s7  }
  0x10   : > { %p1935_p5 = por %p158_p2, %p157_p0  ;;  %p1939_p6 = por %p164_p4, %p163_p3 }
  0x11   : > { %p1220_p7 = scmp.ge.s32.totalorder %s1853_s28, 1  ;;  %p171_p8 = scmp.lt.s32.totalorder %s1853_s28, 7 }
  0x12   : > { %p1221_p9 = scmp.ne.s32.totalorder %s1918_s0, 0  ;;  %p1686_p10 = scmp.eq.s32.totalorder %s1918_s0, 0 }
  0x13   : > { %p172_p11 = pnand %p1220_p7, %p171_p8  ;;  %s188_s14 = sshll.u32 %s2088_s4, 4  ;;  %s189_s14 = int_to_ptr.hbm [resolvable:$true] %s188_s14 }
  0x14   : > { %s1856_s15 = smov [#allocation5]   ;;  %s1857_s17 = smov 320  }
  0x15   : > { %p1678_p12 = pneg %p172_p11  ;;  %s190_s16 = sshll.u32 %s1856_s15, 4  ;;  %s191_s16 = int_to_ptr.vmem [resolvable:$true] %s190_s16 }
  0x16   : > { %s1858_s18 = smov 20   ;;  %217 = sbr.rel (%p172_p11) target bundleno = 1314 (0x522), region = 40 }
  0x17   : > { %p1679_p13 = pnand %p1686_p10, %p1678_p12 }
  0x19   : > { %1681 = dma.hbm_to_vmem [thread:$0]  (!%p1679_p13), %s189_s14, 10240, %s191_s16, [#allocation6], %s1857_s17, %s1857_s17, %s1858_s18  }
  0x1b   : > { %1832 = dma.done.wait (%p1686_p10), [#allocation6], 10240  }
  0x1c   : > { %1834 = vsyncadd (%p1686_p10), [#allocation6], 4294957056  ;;  %s242_s19 = sand.u32 1, %s1845_s26   ;;  %s245_s20 = sld [smem:[#allocation4 + %s1918_s0]] }
  0x1d   : > { %s1960_s21 = smul.u32 3, %s242_s19 }
  0x1f   : > { %s244_s29 = scalar_lea.vmem [#allocation8], %s1960_s21 }
  0x21   : > { %253 = sbr.rel (%p1221_p9) target bundleno = 40 (0x28), region = 48 }
  0x22   : > { %p246_p0 = scmp.lt.s32.totalorder %s245_s20, 63 }
  0x24   : > { %s2098_s20 = smov (!%p246_p0, %s245_s20), 63 }
  0x25   : > { %s248_s24 = scalar_lea.vmem %s2085_s1, %s2098_s20 }
  0x26   : > { %v254_v0 = vld [vmem:[%s2086_s2] sm:$0x1] }
  0x27   : > { %255 = vst [vmem:[#allocation2] sm:$0x1] %v254_v0 }
  0x28 PF: > { %v1368_v1 = vld [vmem:[#allocation5 + $0x118] sm:$0xf]  ;;  %v1619_v2 = vld [vmem:[#allocation5 + $0x128] sm:$0xf0]  ;;  %v1348_v3 = vld [vmem:[#allocation5 + $0xf0] sm:$0xf] }
  0x29   : > { %v1369_v4 = vor.u32 %v1619_v2, %v1368_v1  ;;  %v1614_v5 = vld [vmem:[#allocation5 + $0x100] sm:$0xf0]  ;;  %v1328_v7 = vld [vmem:[#allocation5 + $0xc8] sm:$0xf]  ;;  %v1609_v8 = vld [vmem:[#allocation5 + $0xd8] sm:$0xf0] }
  0x2a   : > { %v1349_v6 = vor.u32 %v1614_v5, %v1348_v3  ;;  %v1329_v9 = vor.u32 %v1609_v8, %v1328_v7  ;;  %v1308_v10 = vld [vmem:[#allocation5 + $0xa0] sm:$0xf]  ;;  %v1604_v11 = vld [vmem:[#allocation5 + $0xb0] sm:$0xf0]  ;;  %v1288_v13 = vld [vmem:[#allocation5 + $0x78] sm:$0xf] }
  0x2b   : > { %518 = vmatpush.bf16.msra.mxu0 %v1369_v4  ;;  %v1309_v12 = vor.u32 %v1604_v11, %v1308_v10  ;;  %v1599_v14 = vld [vmem:[#allocation5 + $0x88] sm:$0xf0]  ;;  %v1268_v16 = vld [vmem:[#allocation5 + $0x50] sm:$0xf]  ;;  %v1594_v17 = vld [vmem:[#allocation5 + $0x60] sm:$0xf0] }
  0x2c   : > { %v1289_v15 = vor.u32 %v1599_v14, %v1288_v13  ;;  %v1269_v18 = vor.u32 %v1594_v17, %v1268_v16  ;;  %v257_v19 = vld [vmem:[%s248_s24] sm:$0x1]  ;;  %v1248_v20 = vld [vmem:[#allocation5 + $0x28] sm:$0xf]  ;;  %v1228_v25 = vld [vmem:[#allocation5] sm:$0xf] }
  0x2d   : > { %v1589_v21 = vld [vmem:[#allocation5 + $0x38] sm:$0xf0]  ;;  %v258_v22 = vunpack.c.l.bf16 %v257_v19  ;;  %v1584_v26 = vld [vmem:[#allocation5 + $0x10] sm:$0xf0]  ;;  %vm584_vm0 = vcmask 1040384   ;;  %v1627_v2 = vld [vmem:[%s2087_s3 + $0x28] sm:$0xff] }
  0x2e   : > { %v1249_v23 = vor.u32 %v1589_v21, %v1248_v20  ;;  %v1974_v24 = vld [vmem:[#allocation2] sm:$0x1]  ;;  %v1229_v28 = vor.u32 %v1584_v26, %v1228_v25  ;;  %v1370_v36 = vld [vmem:[#allocation5 + $0x12c] sm:$0xf0]  ;;  %v1612_v37 = vld [vmem:[#allocation5 + $0xf4] sm:$0xf] }
  0x2f   : > { %519 = vmatpush.bf16.msra.mxu0 %v1349_v6  ;;  %v260_v27 = vadd.f32 %v258_v22, %v1974_v24  ;;  %v1983_v30 = vld [vmem:[%s2089_s5] sm:$0xff]  ;;  %v1350_v39 = vld [vmem:[#allocation5 + $0x104] sm:$0xf0]  ;;  %v1607_v41 = vld [vmem:[#allocation5 + $0xcc] sm:$0xf]  ;;  %s1671_s17 = smul.u32 3, %s1918_s0 }
  0x30   : > { %v1617_v35 = vld [vmem:[#allocation5 + $0x11c] sm:$0xf]  ;;  %v1353_v40 = vor.u32 %v1612_v37, %v1350_v39  ;;  %v1330_v42 = vld [vmem:[#allocation5 + $0xdc] sm:$0xf0]  ;;  %v1602_v44 = vld [vmem:[#allocation5 + $0xa4] sm:$0xf] }
  0x31   : > { %v1977_v29 = vpack.c.bf16 %v260_v27, %v260_v27  ;;  %v1373_v38 = vor.u32 %v1617_v35, %v1370_v36  ;;  %v1333_v43 = vor.u32 %v1607_v41, %v1330_v42  ;;  %v1310_v45 = vld [vmem:[#allocation5 + $0xb4] sm:$0xf0]  ;;  %v1597_v47 = vld [vmem:[#allocation5 + $0x7c] sm:$0xf]  ;;  %v1290_v48 = vld [vmem:[#allocation5 + $0x8c] sm:$0xf0]  ;;  %s1146_s22 = scalar_lea.hbm %s2090_s6, %s1671_s17 }
  0x32   : > { %v1313_v46 = vor.u32 %v1602_v44, %v1310_v45  ;;  %v1293_v49 = vor.u32 %v1597_v47, %v1290_v48  ;;  %v1592_v50 = vld [vmem:[#allocation5 + $0x54] sm:$0xf]  ;;  %v1270_v51 = vld [vmem:[#allocation5 + $0x64] sm:$0xf0]  ;;  %v1587_v55 = vld [vmem:[#allocation5 + $0x2c] sm:$0xf] }
  0x33   : > { %520 = vmatpush.bf16.msra.mxu0 %v1329_v9  ;;  %531 = vmatpush.bf16.msra.mxu1 %v1373_v38  ;;  %v1273_v53 = vor.u32 %v1592_v50, %v1270_v51  ;;  %v1250_v56 = vld [vmem:[#allocation5 + $0x3c] sm:$0xf0]  ;;  %v1582_v59 = vld [vmem:[#allocation5 + $0x4] sm:$0xf]  ;;  %v1230_v60 = vld [vmem:[#allocation5 + $0x14] sm:$0xf0] }
  0x34   : > { %v1253_v58 = vor.u32 %v1587_v55, %v1250_v56  ;;  %v1233_v61 = vor.u32 %v1582_v59, %v1230_v60  ;;  %v1629_v62 = vld [vmem:[%s2087_s3 + $0x38] sm:$0xff]  ;;  %v1628_v1 = vld [vmem:[%s2087_s3 + $0x30] sm:$0xff]  ;;  %v1626_v3 = vld [vmem:[%s2087_s3 + $0x20] sm:$0xff]  ;;  %s1148_s23 = sshll.u32 %s244_s29, 4  ;;  %s1150_s24 = sshll.u32 %s1146_s22, 4  ;;  %vm1127_vm13 = vcmask 1041408   ;;  %s1149_s23 = int_to_ptr.vmem [resolvable:$true] %s1148_s23  ;;  %s1151_s24 = int_to_ptr.hbm [resolvable:$true] %s1150_s24 }
  0x35   : > { %v1625_v4 = vld [vmem:[%s2087_s3 + $0x18] sm:$0xff]  ;;  %v1624_v5 = vld [vmem:[%s2087_s3 + $0x10] sm:$0xff]  ;;  %v1623_v6 = vld [vmem:[%s2087_s3 + $0x8] sm:$0xff]  ;;  %s1136_s0 = scalar_lea.sflag [#allocation7], %s242_s19  ;;  %s1799_s7 = sshra.s32 %s1151_s24, 4  ;;  %s1800_s7 = int_to_ptr.hbm [resolvable:$true] %s1799_s7 }
  0x36   : > { %v1622_v7 = vld [vmem:[%s2087_s3] sm:$0xff]  ;;  %v1620_v9 = vld [vmem:[#allocation5 + $0x130] sm:$0xf0]  ;;  %v1356_v10 = vld [vmem:[#allocation5 + $0xf8] sm:$0xf]  ;;  %s1801_s8 = scalar_lea.hbm %s1800_s7, 3  ;;  %p1806_p4 = scmp.lt.s32.totalorder %s1800_s7, %s2090_s6 }
  0x37   : > { %521 = vmatpush.bf16.msra.mxu0 %v1309_v12  ;;  %532 = vmatpush.bf16.msra.mxu1 %v1353_v40  ;;  %v1376_v8 = vld [vmem:[#allocation5 + $0x120] sm:$0xf]  ;;  %v1615_v12 = vld [vmem:[#allocation5 + $0x108] sm:$0xf0]  ;;  %v1336_v14 = vld [vmem:[#allocation5 + $0xd0] sm:$0xf]  ;;  %p1802_p1 = scmp.ne.s32.totalorder %s1800_s7, %s1801_s8 }
  0x38   : > { %v1377_v11 = vor.u32 %v1620_v9, %v1376_v8  ;;  %v1357_v13 = vor.u32 %v1615_v12, %v1356_v10  ;;  %v1316_v17 = vld [vmem:[#allocation5 + $0xa8] sm:$0xf]  ;;  %v1296_v21 = vld [vmem:[#allocation5 + $0x80] sm:$0xf]  ;;  %v1600_v22 = vld [vmem:[#allocation5 + $0x90] sm:$0xf0] }
  0x39   : > { %v1276_v25 = vld [vmem:[#allocation5 + $0x58] sm:$0xf]  ;;  %v1595_v26 = vld [vmem:[#allocation5 + $0x68] sm:$0xf0]  ;;  %v1236_v41 = vld [vmem:[#allocation5 + $0x8] sm:$0xf]  ;;  %p1803_p2 = pnand %p1802_p1, %p1935_p5 }
  0x3a   : > { %544 = vmatpush.bf16.msra.mxu2 %v1377_v11  ;;  %v1585_v42 = vld [vmem:[#allocation5 + $0x18] sm:$0xf0]  ;;  %v1448_v44 = vld [vmem:[#allocation5 + $0x258] sm:$0xf]  ;;  %v1637_v45 = vld [vmem:[#allocation5 + $0x268] sm:$0xf0] }
  0x3b   : > { %522 = vmatpush.bf16.msra.mxu0 %v1289_v15  ;;  %533 = vmatpush.bf16.msra.mxu1 %v1333_v43  ;;  %v1610_v15 = vld [vmem:[#allocation5 + $0xe0] sm:$0xf0]  ;;  %v1237_v48 = vor.u32 %v1585_v42, %v1236_v41  ;;  %v1449_v50 = vor.u32 %v1637_v45, %v1448_v44  ;;  %v1444_v51 = vld [vmem:[#allocation5 + $0x230] sm:$0xf]  ;;  %v1440_v56 = vld [vmem:[#allocation5 + $0x208] sm:$0xf]  ;;  %p1804_p3 = pneg %p1803_p2 }
  0x3c   : > { %v1337_v16 = vor.u32 %v1610_v15, %v1336_v14  ;;  %v1436_v59 = vld [vmem:[#allocation5 + $0x1e0] sm:$0xf]  ;;  %v1634_v60 = vld [vmem:[#allocation5 + $0x1f0] sm:$0xf0]  ;;  %v1618_v10 = vld [vmem:[#allocation5 + $0x124] sm:$0xf] }
  0x3d   : > { %v1630_v8 = vld [vmem:[#allocation5 + $0x150] sm:$0xf0]  ;;  %v1378_v11 = vld [vmem:[#allocation5 + $0x134] sm:$0xf0]  ;;  %v1384_v12 = vld [vmem:[#allocation5 + $0x128] sm:$0xf] }
  0x3e   : > { %545 = vmatpush.bf16.msra.mxu2 %v1357_v13  ;;  %v1381_v13 = vor.u32 %v1618_v10, %v1378_v11  ;;  %v1621_v14 = vld [vmem:[#allocation5 + $0x138] sm:$0xf0]  ;;  %v1661_v41 = vld [vmem:[#allocation5 + $0x274] sm:$0xf0]  ;;  %v1304_v42 = vld [vmem:[#allocation5 + $0x88] sm:$0xf] }
  0x3f   : > { %523 = vmatpush.bf16.msra.mxu0 %v1269_v18  ;;  %534 = vmatpush.bf16.msra.mxu1 %v1313_v46  ;;  %v1605_v18 = vld [vmem:[#allocation5 + $0xb8] sm:$0xf0]  ;;  %s1805_s14 = scalar_lea.hbm %s2090_s6, 18 }
  0x40   : > { %v1317_v20 = vor.u32 %v1605_v18, %v1316_v17  ;;  %v1613_v15 = vld [vmem:[#allocation5 + $0xfc] sm:$0xf]  ;;  %v1385_v17 = vor.u32 %v1621_v14, %v1384_v12  ;;  %v1364_v18 = vld [vmem:[#allocation5 + $0x100] sm:$0xf]  ;;  %557 = vmatpush.bf16.msra.mxu3 %v1381_v13  ;;  %v1660_v12 = vld [vmem:[#allocation5 + $0x26c] sm:$0xf0]  ;;  %p1807_p7 = scmp.lt.s32.totalorder %s1805_s14, %s1801_s8 }
  0x41   : > { %v1532_v45 = vld [vmem:[#allocation5 + $0x23c] sm:$0xf]  ;;  %v1659_v13 = vld [vmem:[#allocation5 + $0x260] sm:$0xf]  ;;  %v1538_v14 = vld [vmem:[#allocation5 + $0x270] sm:$0xf0] }
  0x42   : > { %546 = vmatpush.bf16.msra.mxu2 %v1337_v16  ;;  %v1358_v16 = vld [vmem:[#allocation5 + $0x10c] sm:$0xf0]  ;;  %v1536_v11 = vld [vmem:[#allocation5 + $0x25c] sm:$0xf]  ;;  %p1808_p8 = por %p1807_p7, %p1806_p4 }
  0x43   : > { %524 = vmatpush.bf16.msra.mxu0 %v1249_v23  ;;  %535 = vmatpush.bf16.msra.mxu1 %v1293_v49  ;;  %v1297_v23 = vor.u32 %v1600_v22, %v1296_v21  ;;  %v1608_v22 = vld [vmem:[#allocation5 + $0xd4] sm:$0xf] }
  0x44   : > { %p1809_p9 = pnand %p1808_p8, %p1804_p3 }
  0x46   : > { %547 = vmatpush.bf16.msra.mxu2 %v1317_v20  ;;  %v1361_v20 = vor.u32 %v1613_v15, %v1358_v16  ;;  %v1496_v15 = vld [vmem:[#allocation5 + $0x1c4] sm:$0xf]  ;;  %v1649_v16 = vld [vmem:[#allocation5 + $0x1d4] sm:$0xf0] }
  0x47   : > { %525 = vmatpush.bf16.msra.mxu0 %v1229_v28  ;;  %536 = vmatpush.bf16.msra.mxu1 %v1273_v53 }
  0x48   : > { %558 = vmatpush.bf16.msra.mxu3 %v1361_v20  ;;  %v1541_v20 = vor.u32 %v1659_v13, %v1538_v14  ;;  %v1640_v13 = vld [vmem:[#allocation5 + $0x15c] sm:$0xf0] }
  0x4a   : > { %526 = vmatmul.bf16.vlgmr.msra.gmra.mxu0 %v1977_v29  ;;  %548 = vmatpush.bf16.msra.mxu2 %v1297_v23  ;;  %v1338_v23 = vld [vmem:[#allocation5 + $0xe4] sm:$0xf0] }
  0x4b   : > { %537 = vmatpush.bf16.msra.mxu1 %v1253_v58  ;;  %570 = vmatpush.bf16.msrb.mxu0 %v1385_v17 }
  0x4f   : > { %538 = vmatpush.bf16.msra.mxu1 %v1233_v61  ;;  %v1437_v61 = vor.u32 %v1634_v60, %v1436_v59  ;;  %v1588_v60 = vld [vmem:[#allocation5 + $0x34] sm:$0xf] }
  0x52   : > { %539 = vmatmul.bf16.vlgmr.msra.gmra.mxu1 %v1977_v29 }
  0x53   : > { %674 = vmatpush.bf16.msrb.mxu1 %v1629_v62  ;;  %v1432_v62 = vld [vmem:[#allocation5 + $0x1b8] sm:$0xf] }
  0x57   : > { %675 = vmatpush.bf16.msrb.mxu1 %v1628_v1  ;;  %v1428_v1 = vld [vmem:[#allocation5 + $0x190] sm:$0xf] }
  0x5b   : > { %676 = vmatpush.bf16.msrb.mxu1 %v1627_v2  ;;  %v1632_v2 = vld [vmem:[#allocation5 + $0x1a0] sm:$0xf0] }
  0x5f   : > { %677 = vmatpush.bf16.msrb.mxu1 %v1626_v3  ;;  %v1429_v3 = vor.u32 %v1632_v2, %v1428_v1  ;;  %v1652_v1 = vld [vmem:[#allocation5 + $0x1fc] sm:$0xf0] }
  0x63   : > { %678 = vmatpush.bf16.msrb.mxu1 %v1625_v4  ;;  %v1424_v4 = vld [vmem:[#allocation5 + $0x168] sm:$0xf] }
  0x67   : > { %679 = vmatpush.bf16.msrb.mxu1 %v1624_v5  ;;  %v1631_v5 = vld [vmem:[#allocation5 + $0x178] sm:$0xf0] }
  0x6b   : > { %680 = vmatpush.bf16.msrb.mxu1 %v1623_v6  ;;  %v1425_v6 = vor.u32 %v1631_v5, %v1424_v4 }
  0x6f   : > { %681 = vmatpush.bf16.msrb.mxu1 %v1622_v7  ;;  %v1420_v7 = vld [vmem:[#allocation5 + $0x140] sm:$0xf] }
  0x70   : > { %v1421_v9 = vor.u32 %v1630_v8, %v1420_v7  ;;  %v1244_v7 = vld [vmem:[#allocation5 + $0x10] sm:$0xf]  ;;  %v1586_v8 = vld [vmem:[#allocation5 + $0x20] sm:$0xf0] }
  0xc7   : > { %v527_v31 = vpop.f32.mrf.mxu0 }
  0xc8   : > { %v583_v32 = vadd.f32 %v527_v31, %v1983_v30  ;;  %v1277_v31 = vor.u32 %v1595_v26, %v1276_v25  ;;  %v1344_v25 = vld [vmem:[#allocation5 + $0xd8] sm:$0xf]  ;;  %v1611_v26 = vld [vmem:[#allocation5 + $0xe8] sm:$0xf0] }
  0xca   : > { %v585_v33 = vsel %vm584_vm0, %v583_v32, -inf  ;;  %549 = vmatpush.bf16.msra.mxu2 %v1277_v31  ;;  %v1603_v31 = vld [vmem:[#allocation5 + $0xac] sm:$0xf] }
  0xcb   : > { %586 = vmax.xlane.f32.xlu0 %v585_v33  ;;  %v1256_v33 = vld [vmem:[#allocation5 + $0x30] sm:$0xf] }
  0xcf   : > { %v529_v34 = vpop.f32.mrf.mxu0  ;;  %v2016_v38 = vpop.f32.mrf.mxu1 }
  0xd0   : > { %v1590_v34 = vld [vmem:[#allocation5 + $0x40] sm:$0xf0] }
  0xd1   : > { %v1257_v39 = vor.u32 %v1590_v34, %v1256_v33  ;;  %v1324_v33 = vld [vmem:[#allocation5 + $0xb0] sm:$0xf]  ;;  %v1606_v34 = vld [vmem:[#allocation5 + $0xc0] sm:$0xf0] }
  0xd3   : > { %550 = vmatpush.bf16.msra.mxu2 %v1257_v39  ;;  %v1298_v39 = vld [vmem:[#allocation5 + $0x94] sm:$0xf0] }
  0xd7   : > { %551 = vmatpush.bf16.msra.mxu2 %v1237_v48  ;;  %v1593_v48 = vld [vmem:[#allocation5 + $0x5c] sm:$0xf] }
  0xda   : > { %552 = vmatmul.bf16.vlgmr.msra.gmra.mxu2 %v1977_v29 }
  0xdb   : > { %752 = vmatpush.bf16.msrb.mxu2 %v1449_v50 }
 0x13e   : > { %v587_v52 = vpop.xlane.xlu0 %586 }
 0x13f   : > { %v588_v54 = vsub.f32 %v583_v32, %v587_v52  ;;  %v1636_v52 = vld [vmem:[#allocation5 + $0x240] sm:$0xf0] }
 0x140   : > { %v1445_v55 = vor.u32 %v1636_v52, %v1444_v51  ;;  %v1278_v52 = vld [vmem:[#allocation5 + $0x6c] sm:$0xf0] }
 0x141   : > { %v589_v57 = vmul.f32 1.442695, %v588_v54  ;;  %v542_v54 = vpop.f32.mrf.mxu1 }
 0x142   : > { %753 = vmatpush.bf16.msrb.mxu2 %v1445_v55  ;;  %v1655_v54 = vld [vmem:[#allocation5 + $0x224] sm:$0xf0]  ;;  %v1284_v55 = vld [vmem:[#allocation5 + $0x60] sm:$0xf] }
 0x143   : > { %1725 = vpow2.f32 %v589_v57  ;;  %v1635_v57 = vld [vmem:[#allocation5 + $0x218] sm:$0xf0] }
 0x144   : > { %v1441_v58 = vor.u32 %v1635_v57, %v1440_v56  ;;  %v1596_v56 = vld [vmem:[#allocation5 + $0x70] sm:$0xf0]  ;;  %v1281_v57 = vor.u32 %v1593_v48, %v1278_v52  ;;  %v1648_v52 = vld [vmem:[#allocation5 + $0x1cc] sm:$0xf0] }
 0x145   : > { %v1285_v59 = vor.u32 %v1596_v56, %v1284_v55  ;;  %v1476_v56 = vld [vmem:[#allocation5 + $0x194] sm:$0xf] }
 0x146   : > { %754 = vmatpush.bf16.msrb.mxu2 %v1441_v58 }
 0x149   : > { %v1990_v63 = vpop.eup %1725 }
 0x14a   : > { %v591_v0 = vsel %vm584_vm0, %v1990_v63, 0.0  ;;  %755 = vmatpush.bf16.msrb.mxu2 %v1437_v61  ;;  %v1258_v61 = vld [vmem:[#allocation5 + $0x44] sm:$0xf0] }
 0x14b   : > { %592 = vadd.xlane.f32.xlu0 %v591_v0  ;;  %v1261_v2 = vor.u32 %v1588_v60, %v1258_v61 }
 0x1be   : > { %v593_v19 = vpop.xlane.xlu0 %592 }
 0x1bf   : > { %1727 = vrcp.f32 %v593_v19  ;;  %v605_v35 = vand.u32 2147483648, %v593_v19  ;;  %v603_v37 = vand.u32 2147483647, %v593_v19  ;;  %vm599_vm2 = vweird.f32 %v593_v19 }
 0x1c1   : > { %v606_v43 = vor.u32 1.1754944e-38, %v605_v35  ;;  %vm604_vm4 = vcmp.eq.f32.partialorder %v603_v37, 8.507059e+37  ;;  %v1325_v37 = vor.u32 %v1606_v34, %v1324_v33 }
 0x1c5   : > { %v1728_v27 = vpop.eup %1727 }
 0x1c6   : > { %v595_v28 = vmul.f32 %v1728_v27, %v593_v19  ;;  %vm600_vm1 = vweird.f32 %v1728_v27  ;;  %v1616_v19 = vld [vmem:[#allocation5 + $0x110] sm:$0xf0] }
 0x1c7   : > { %vm601_vm3 = vmor %vm599_vm2, %vm600_vm1  ;;  %v1365_v21 = vor.u32 %v1616_v19, %v1364_v18  ;;  %v1245_v18 = vor.u32 %v1586_v8, %v1244_v7  ;;  %v1537_v19 = vor.u32 %v1660_v12, %v1536_v11  ;;  %v1452_v7 = vld [vmem:[#allocation5 + $0x144] sm:$0xf]  ;;  %v1639_v8 = vld [vmem:[#allocation5 + $0x154] sm:$0xf0] }
 0x1c8   : > { %v596_v32 = vsub.f32 1.0, %v595_v28  ;;  %v1345_v28 = vor.u32 %v1611_v26, %v1344_v25  ;;  %v1497_v25 = vor.u32 %v1649_v16, %v1496_v15  ;;  %v1526_v26 = vld [vmem:[#allocation5 + $0x248] sm:$0xf0]  ;;  %v1454_v11 = vld [vmem:[#allocation5 + $0x158] sm:$0xf0]  ;;  %v767_v16 = vperm.slane %v1983_v30, 1 }
 0x1c9   : > { %571 = vmatpush.bf16.msrb.mxu0 %v1365_v21  ;;  %v1524_v21 = vld [vmem:[#allocation5 + $0x234] sm:$0xf]  ;;  %v1460_v12 = vld [vmem:[#allocation5 + $0x14c] sm:$0xf] }
 0x1ca   : > { %v597_v36 = vmul.f32 %v1728_v27, %v596_v32  ;;  %v1318_v32 = vld [vmem:[#allocation5 + $0xbc] sm:$0xf0]  ;;  %v1461_v15 = vor.u32 %v1640_v13, %v1460_v12 }
 0x1cb   : > { %v1321_v35 = vor.u32 %v1603_v31, %v1318_v32  ;;  %v2024_v32 = vpop.f32.mrf.mxu2 }
 0x1cc   : > { %v598_v40 = vadd.f32 %v1728_v27, %v597_v36  ;;  %v1598_v36 = vld [vmem:[#allocation5 + $0x84] sm:$0xf] }
 0x1cd   : > { %572 = vmatpush.bf16.msrb.mxu0 %v1345_v28  ;;  %v1646_v28 = vld [vmem:[#allocation5 + $0x1ac] sm:$0xf0] }
 0x1ce   : > { %v602_v46 = vsel %vm601_vm3, %v1728_v27, %v598_v40  ;;  %v1341_v27 = vor.u32 %v1608_v22, %v1338_v23  ;;  %v1544_v40 = vld [vmem:[#allocation5 + $0x264] sm:$0xf]  ;;  %v1657_v22 = vld [vmem:[#allocation5 + $0x244] sm:$0xf0]  ;;  %v1656_v23 = vld [vmem:[#allocation5 + $0x238] sm:$0xf] }
 0x1cf   : > { %v607_v47 = vsel %vm604_vm4, %v606_v43, %v602_v46  ;;  %v1601_v43 = vld [vmem:[#allocation5 + $0x98] sm:$0xf0]  ;;  %v1545_v44 = vor.u32 %v1661_v41, %v1544_v40  ;;  %v1658_v46 = vld [vmem:[#allocation5 + $0x24c] sm:$0xf0]  ;;  %v1525_v33 = vor.u32 %v1657_v22, %v1524_v21  ;;  %v1529_v34 = vor.u32 %v1656_v23, %v1526_v26  ;;  %v1514_v40 = vld [vmem:[#allocation5 + $0x220] sm:$0xf0] }
 0x1d0   : > { %v2019_v49 = vmul.f32 %v1990_v63, %v607_v47  ;;  %v1633_v63 = vld [vmem:[#allocation5 + $0x1c8] sm:$0xf0]  ;;  %559 = vmatpush.bf16.msra.mxu3 %v1341_v27  ;;  %v1301_v47 = vor.u32 %v1598_v36, %v1298_v39  ;;  %v1533_v50 = vor.u32 %v1658_v46, %v1532_v45  ;;  %v1305_v51 = vor.u32 %v1601_v43, %v1304_v42  ;;  %v1484_v27 = vld [vmem:[#allocation5 + $0x19c] sm:$0xf]  ;;  %v1654_v36 = vld [vmem:[#allocation5 + $0x21c] sm:$0xf0] }
 0x1d1   : > { %v1433_v0 = vor.u32 %v1633_v63, %v1432_v62  ;;  %964 = vmatpush.bf16.msra.mxu1 %v1545_v44  ;;  %573 = vmatpush.bf16.msrb.mxu0 %v1325_v37  ;;  %v1264_v62 = vld [vmem:[#allocation5 + $0x38] sm:$0xf]  ;;  %v1591_v63 = vld [vmem:[#allocation5 + $0x48] sm:$0xf0]  ;;  %v1485_v37 = vor.u32 %v1646_v28, %v1484_v27  ;;  %v1653_v39 = vld [vmem:[#allocation5 + $0x210] sm:$0xf] }
 0x1d2   : > { %v609_v53 = vpack.c.bf16 %v2019_v49, %v2019_v49  ;;  %v1265_v5 = vor.u32 %v1591_v63, %v1264_v62  ;;  %v1517_v42 = vor.u32 %v1653_v39, %v1514_v40  ;;  %v1500_v43 = vld [vmem:[#allocation5 + $0x1e4] sm:$0xf]  ;;  %v1651_v44 = vld [vmem:[#allocation5 + $0x1f4] sm:$0xf0]  ;;  %v1650_v45 = vld [vmem:[#allocation5 + $0x1e8] sm:$0xf] }
 0x1d3   : > { %756 = vmatpush.bf16.msrb.mxu2 %v1433_v0  ;;  %v1508_v0 = vld [vmem:[#allocation5 + $0x1ec] sm:$0xf]  ;;  %v1502_v46 = vld [vmem:[#allocation5 + $0x1f8] sm:$0xf0]  ;;  %v1501_v48 = vor.u32 %v1651_v44, %v1500_v43  ;;  %v1642_v63 = vld [vmem:[#allocation5 + $0x17c] sm:$0xf0] }
 0x1d4   : > { %682 = vmatmul.bf16.vlgmr.msrb.gmra.mxu1 %v609_v53  ;;  %560 = vmatpush.bf16.msra.mxu3 %v1321_v35  ;;  %v1520_v53 = vld [vmem:[#allocation5 + $0x214] sm:$0xf]  ;;  %v1512_v35 = vld [vmem:[#allocation5 + $0x20c] sm:$0xf]  ;;  %v1578_v28 = vld [vmem:[#allocation5 + $0x268] sm:$0xf] }
 0x1d5   : > { %965 = vmatpush.bf16.msra.mxu1 %v1533_v50  ;;  %v1521_v58 = vor.u32 %v1655_v54, %v1520_v53  ;;  %574 = vmatpush.bf16.msrb.mxu0 %v1305_v51  ;;  %v1513_v41 = vor.u32 %v1654_v36, %v1512_v35  ;;  %v1505_v50 = vor.u32 %v1650_v45, %v1502_v46  ;;  %v1488_v51 = vld [vmem:[#allocation5 + $0x1bc] sm:$0xf]  ;;  %v1647_v53 = vld [vmem:[#allocation5 + $0x1c0] sm:$0xf]  ;;  %v1490_v54 = vld [vmem:[#allocation5 + $0x1d0] sm:$0xf0] }
 0x1d6   : > { %v1493_v55 = vor.u32 %v1647_v53, %v1490_v54  ;;  %v1464_v62 = vld [vmem:[#allocation5 + $0x16c] sm:$0xf]  ;;  %v1668_v35 = vld [vmem:[#allocation5 + $0x250] sm:$0xf0]  ;;  %v932_v45 = vperm.slane %v1983_v30, 2 }
 0x1d7   : > { %757 = vmatpush.bf16.msrb.mxu2 %v1429_v3  ;;  %v1583_v3 = vld [vmem:[#allocation5 + $0xc] sm:$0xf]  ;;  %v1566_v46 = vld [vmem:[#allocation5 + $0x1f0] sm:$0xf]  ;;  %v1562_v53 = vld [vmem:[#allocation5 + $0x1c8] sm:$0xf] }
 0x1d8   : > { %561 = vmatpush.bf16.msra.mxu3 %v1301_v47  ;;  %v555_v47 = vpop.f32.mrf.mxu2  ;;  %v1667_v39 = vld [vmem:[#allocation5 + $0x228] sm:$0xf0]  ;;  %v1665_v54 = vld [vmem:[#allocation5 + $0x1d8] sm:$0xf0] }
 0x1d9   : > { %966 = vmatpush.bf16.msra.mxu1 %v1521_v58  ;;  %575 = vmatpush.bf16.msrb.mxu0 %v1285_v59  ;;  %v1644_v58 = vld [vmem:[#allocation5 + $0x198] sm:$0xf]  ;;  %v1478_v59 = vld [vmem:[#allocation5 + $0x1a8] sm:$0xf0]  ;;  %v1666_v47 = vld [vmem:[#allocation5 + $0x200] sm:$0xf0] }
 0x1da   : > { %v1481_v61 = vor.u32 %v1644_v58, %v1478_v59 }
 0x1db   : > { %758 = vmatpush.bf16.msrb.mxu2 %v1425_v6  ;;  %v1238_v6 = vld [vmem:[#allocation5 + $0x1c] sm:$0xf0] }
 0x1dc   : > { %562 = vmatpush.bf16.msra.mxu3 %v1281_v57  ;;  %v1241_v17 = vor.u32 %v1583_v3, %v1238_v6  ;;  %v1645_v57 = vld [vmem:[#allocation5 + $0x1a4] sm:$0xf0]  ;;  %v1472_v3 = vld [vmem:[#allocation5 + $0x174] sm:$0xf] }
 0x1dd   : > { %576 = vmatpush.bf16.msrb.mxu0 %v1265_v5  ;;  %v1477_v60 = vor.u32 %v1645_v57, %v1476_v56  ;;  %v1563_v56 = vor.u32 %v1665_v54, %v1562_v53  ;;  %v1664_v57 = vld [vmem:[#allocation5 + $0x1b0] sm:$0xf0] }
 0x1df   : > { %759 = vmatpush.bf16.msrb.mxu2 %v1421_v9  ;;  %v1509_v9 = vor.u32 %v1652_v1, %v1508_v0  ;;  %v1641_v0 = vld [vmem:[#allocation5 + $0x170] sm:$0xf]  ;;  %v1465_v1 = vor.u32 %v1642_v63, %v1464_v62  ;;  %v1554_v62 = vld [vmem:[#allocation5 + $0x178] sm:$0xf]  ;;  %v1663_v63 = vld [vmem:[#allocation5 + $0x188] sm:$0xf0] }
 0x1e0   : > { %563 = vmatpush.bf16.msra.mxu3 %v1261_v2  ;;  %v1466_v2 = vld [vmem:[#allocation5 + $0x180] sm:$0xf0] }
 0x1e1   : > { %967 = vmatpush.bf16.msra.mxu1 %v1509_v9  ;;  %577 = vmatpush.bf16.msrb.mxu0 %v1245_v18  ;;  %v1469_v5 = vor.u32 %v1641_v0, %v1466_v2  ;;  %v1638_v9 = vld [vmem:[#allocation5 + $0x148] sm:$0xf] }
 0x1e2   : > { %v1457_v14 = vor.u32 %v1638_v9, %v1454_v11 }
 0x1e4   : > { %564 = vmatpush.bf16.msra.mxu3 %v1241_v17  ;;  %578 = vmatmul.bf16.vlgmr.msrb.gmra.mxu0 %v1977_v29 }
 0x1e5   : > { %951 = vmatpush.bf16.msra.mxu0 %v1541_v20  ;;  %968 = vmatpush.bf16.msra.mxu1 %v1497_v25 }
 0x1e7   : > { %565 = vmatmul.bf16.vlgmr.msra.gmra.mxu3 %v1977_v29  ;;  %v1489_v29 = vor.u32 %v1648_v52, %v1488_v51 }
 0x1e8   : > { %938 = vmatpush.bf16.msrb.mxu3 %v1537_v19 }
 0x1e9   : > { %952 = vmatpush.bf16.msra.mxu0 %v1529_v34  ;;  %969 = vmatpush.bf16.msra.mxu1 %v1485_v37  ;;  %v1574_v34 = vld [vmem:[#allocation5 + $0x240] sm:$0xf]  ;;  %v1570_v37 = vld [vmem:[#allocation5 + $0x218] sm:$0xf] }
 0x1ea   : > { %v1575_v36 = vor.u32 %v1668_v35, %v1574_v34 }
 0x1ec   : > { %939 = vmatpush.bf16.msrb.mxu3 %v1525_v33 }
 0x1ed   : > { %953 = vmatpush.bf16.msra.mxu0 %v1517_v42 }
 0x1f0   : > { %940 = vmatpush.bf16.msrb.mxu3 %v1513_v41  ;;  %v1571_v41 = vor.u32 %v1667_v39, %v1570_v37 }
 0x1f1   : > { %954 = vmatpush.bf16.msra.mxu0 %v1505_v50 }
 0x1f4   : > { %941 = vmatpush.bf16.msrb.mxu3 %v1501_v48  ;;  %v1567_v48 = vor.u32 %v1666_v47, %v1566_v46 }
 0x1f5   : > { %955 = vmatpush.bf16.msra.mxu0 %v1493_v55 }
 0x1f8   : > { %942 = vmatpush.bf16.msrb.mxu3 %v1489_v29  ;;  %v1558_v29 = vld [vmem:[#allocation5 + $0x1a0] sm:$0xf] }
 0x1f9   : > { %956 = vmatpush.bf16.msra.mxu0 %v1481_v61 }
 0x1fc   : > { %943 = vmatpush.bf16.msrb.mxu3 %v1477_v60  ;;  %v1559_v60 = vor.u32 %v1664_v57, %v1558_v29 }
 0x1fd   : > { %957 = vmatpush.bf16.msra.mxu0 %v1469_v5  ;;  %v1662_v5 = vld [vmem:[#allocation5 + $0x160] sm:$0xf0] }
 0x200   : > { %944 = vmatpush.bf16.msrb.mxu3 %v1465_v1 }
 0x201   : > { %958 = vmatpush.bf16.msra.mxu0 %v1457_v14 }
 0x251   : > { %v683_v4 = vpop.f32.mrf.mxu1 }
 0x252   : > { %v687_v10 = vpack.c.bf16 %v683_v4, %v683_v4  ;;  %v1643_v4 = vld [vmem:[#allocation5 + $0x184] sm:$0xf0] }
 0x253   : > { %v1473_v6 = vor.u32 %v1643_v4, %v1472_v3  ;;  %v1555_v3 = vor.u32 %v1663_v63, %v1554_v62  ;;  %v1550_v4 = vld [vmem:[#allocation5 + $0x150] sm:$0xf] }
 0x254   : > { %760 = vmatmul.bf16.vlgmr.msrb.gmra.mxu2 %v687_v10  ;;  %v1453_v10 = vor.u32 %v1639_v8, %v1452_v7 }
 0x255   : > { %970 = vmatpush.bf16.msra.mxu1 %v1473_v6  ;;  %v1551_v6 = vor.u32 %v1662_v5, %v1550_v4 }
 0x256   : > { %945 = vmatpush.bf16.msrb.mxu3 %v1453_v10 }
 0x259   : > { %v685_v31 = vpop.f32.mrf.mxu1  ;;  %971 = vmatpush.bf16.msra.mxu1 %v1461_v15  ;;  %v1017_v15 = vperm.slane %v1983_v30, 5 }
 0x25a   : > { %v1669_v31 = vld [vmem:[#allocation5 + $0x278] sm:$0xf0] }
 0x25b   : > { %v1579_v33 = vor.u32 %v1669_v31, %v1578_v28 }
 0x25d   : > { %1094 = vmatpush.bf16.msra.mxu2 %v1579_v33 }
 0x261   : > { %v2030_v19 = vpop.f32.mrf.mxu0  ;;  %1095 = vmatpush.bf16.msra.mxu2 %v1575_v36 }
 0x265   : > { %1096 = vmatpush.bf16.msra.mxu2 %v1571_v41 }
 0x269   : > { %v581_v26 = vpop.f32.mrf.mxu0  ;;  %1097 = vmatpush.bf16.msra.mxu2 %v1567_v48 }
 0x26a   : > { %v566_v23 = vpop.f32.mrf.mxu3 }
 0x26d   : > { %1098 = vmatpush.bf16.msra.mxu2 %v1563_v56 }
 0x271   : > { %1099 = vmatpush.bf16.msra.mxu2 %v1559_v60 }
 0x272   : > { %v568_v27 = vpop.f32.mrf.mxu3 }
 0x275   : > { %1100 = vmatpush.bf16.msra.mxu2 %v1555_v3 }
 0x279   : > { %1101 = vmatpush.bf16.msra.mxu2 %v1551_v6 }
 0x2d7   : > { %v761_v17 = vpop.f32.mrf.mxu2 }
 0x2d8   : > { %v765_v18 = vadd.f32 %v761_v17, %v2016_v38  ;;  %v933_v38 = vperm.slane %v1983_v30, 3 }
 0x2da   : > { %v769_v20 = vadd.f32 %v767_v16, %v765_v18 }
 0x2dc   : > { %v770_v21 = vmax.f32 %v769_v20, 0.0  ;;  %v934_v20 = vperm.slane %v1983_v30, 4 }
 0x2de   : > { %v771_v22 = vpack.c.bf16 %v770_v21, %v770_v21 }
 0x2df   : > { %v763_v25 = vpop.f32.mrf.mxu2 }
 0x2e0   : > { %946 = vmatmul.bf16.vlgmr.msrb.gmra.mxu3 %v771_v22  ;;  %959 = vmatmul.bf16.vlgmr.msra.gmra.mxu0 %v771_v22 }
 0x2e1   : > { %972 = vmatmul.bf16.vlgmr.msra.gmra.mxu1 %v771_v22 }
 0x35d   : > { %v960_v40 = vpop.f32.mrf.mxu0 }
 0x35e   : > { %v961_v42 = vadd.f32 %v960_v40, %v933_v38  ;;  %v2033_v43 = vpop.f32.mrf.mxu1 }
 0x35f   : > { %v974_v31 = vadd.f32 %v2033_v43, %v934_v20  ;;  %v1092_v43 = vperm.slane %v1983_v30, 6 }
 0x360   : > { %v997_v44 = vadd.f32 %v961_v42, %v566_v23  ;;  %v1019_v23 = vadd.f32 %v1017_v15, %v2030_v19 }
 0x362   : > { %v1547_v50 = vmul.f32 -1.442695, %v997_v44 }
 0x363   : > { %v947_v51 = vpop.f32.mrf.mxu3 }
 0x364   : > { %1729 = vpow2.f32 %v1547_v50  ;;  %v948_v52 = vadd.f32 %v947_v51, %v932_v45 }
 0x365   : > { %v962_v55 = vpop.f32.mrf.mxu0 }
 0x366   : > { %v977_v58 = vadd.f32 %v948_v52, %v2024_v32  ;;  %v975_v59 = vpop.f32.mrf.mxu1  ;;  %v1130_v55 = vlaneseq }
 0x367   : > { %v1125_v59 = vrot.slane %v2019_v49, 6 }
 0x368   : > { %v1546_v61 = vmul.f32 -1.442695, %v977_v58  ;;  %vm1132_vm14 = vcmp.lt.s32.totalorder %v1130_v55, 384 }
 0x36a   : > { %v1730_v0 = vpop.eup %1729  ;;  %1731 = vpow2.f32 %v1546_v61 }
 0x36b   : > { %v1001_v1 = vadd.f32 1.0, %v1730_v0  ;;  %v949_v2 = vpop.f32.mrf.mxu3 }
 0x36d   : > { %1733 = vrcp.f32 %v1001_v1  ;;  %v1013_v28 = vand.u32 2147483648, %v1001_v1  ;;  %vm1007_vm10 = vweird.f32 %v1001_v1  ;;  %v1011_v34 = vand.u32 2147483647, %v1001_v1 }
 0x36f   : > { %v1014_v38 = vor.u32 1.1754944e-38, %v1013_v28  ;;  %vm1012_vm12 = vcmp.eq.f32.partialorder %v1011_v34, 8.507059e+37 }
 0x370   : > { %v1732_v7 = vpop.eup %1731 }
 0x371   : > { %v981_v8 = vadd.f32 1.0, %v1732_v7 }
 0x373   : > { %1735 = vrcp.f32 %v981_v8  ;;  %v1734_v32 = vpop.eup %1733  ;;  %v993_v14 = vand.u32 2147483648, %v981_v8  ;;  %v991_v17 = vand.u32 2147483647, %v981_v8  ;;  %vm987_vm6 = vweird.f32 %v981_v8 }
 0x374   : > { %v1003_v9 = vmul.f32 %v1734_v32, %v1001_v1  ;;  %vm1008_vm9 = vweird.f32 %v1734_v32 }
 0x375   : > { %v994_v22 = vor.u32 1.1754944e-38, %v993_v14  ;;  %vm992_vm8 = vcmp.eq.f32.partialorder %v991_v17, 8.507059e+37  ;;  %vm1009_vm11 = vmor %vm1007_vm10, %vm1008_vm9 }
 0x376   : > { %v1004_v12 = vsub.f32 1.0, %v1003_v9 }
 0x378   : > { %v1005_v18 = vmul.f32 %v1734_v32, %v1004_v12 }
 0x379   : > { %v1736_v10 = vpop.eup %1735 }
 0x37a   : > { %v983_v11 = vmul.f32 %v1736_v10, %v981_v8  ;;  %vm988_vm5 = vweird.f32 %v1736_v10  ;;  %v1006_v27 = vadd.f32 %v1734_v32, %v1005_v18 }
 0x37b   : > { %vm989_vm7 = vmor %vm987_vm6, %vm988_vm5 }
 0x37c   : > { %v984_v13 = vsub.f32 1.0, %v983_v11  ;;  %v1010_v36 = vsel %vm1009_vm11, %v1734_v32, %v1006_v27 }
 0x37d   : > { %v1015_v37 = vsel %vm1012_vm12, %v1014_v38, %v1010_v36 }
 0x37e   : > { %v985_v16 = vmul.f32 %v1736_v10, %v984_v13  ;;  %v1023_v39 = vsub.f32 1.0, %v1015_v37  ;;  %v1025_v41 = vmul.f32 %v1015_v37, %v1974_v24 }
 0x380   : > { %v986_v21 = vadd.f32 %v1736_v10, %v985_v16 }
 0x382   : > { %v990_v25 = vsel %vm989_vm7, %v1736_v10, %v986_v21 }
 0x383   : > { %v995_v26 = vsel %vm992_vm8, %v994_v22, %v990_v25 }
 0x384   : > { %v1020_v33 = vmul.f32 %v1019_v23, %v995_v26 }
 0x386   : > { %v1021_v35 = vadd.f32 %v1020_v33, %v974_v31 }
 0x388   : > { %1737 = vtanh.f32 %v1021_v35 }
 0x38e   : > { %v1738_v19 = vpop.eup %1737 }
 0x38f   : > { %v1024_v40 = vmul.f32 %v1738_v19, %v1023_v39 }
 0x391   : > { %v1026_v42 = vadd.f32 %v1025_v41, %v1024_v40 }
 0x393   : > { %v1027_v44 = vpack.c.bf16 %v1026_v42, %v1026_v42  ;;  %1120 = vst [vmem:[#allocation2] sm:$0x1] %v1026_v42  ;;  %v1124_v58 = vrot.slane %v1026_v42, 7 }
 0x395   : > { %1102 = vmatmul.bf16.vlgmr.msra.gmra.mxu2 %v1027_v44 }
 0x418   : > { %v1103_v45 = vpop.f32.mrf.mxu2 }
 0x419   : > { %v1104_v46 = vadd.f32 %v1103_v45, %v1092_v43 }
 0x41b   : > { %v1107_v47 = vsel %vm584_vm0, %v1104_v46, -inf }
 0x41c   : > { %1108 = vmax.xlane.f32.xlu1 %v1107_v47 }
 0x420   : > { %v1105_v48 = vpop.f32.mrf.mxu2 }
 0x48f   : > { %v1109_v50 = vpop.xlane.xlu1 %1108 }
 0x490   : > { %v1110_v51 = vsub.f32 %v1104_v46, %v1109_v50 }
 0x492   : > { %v1111_v52 = vmul.f32 1.442695, %v1110_v51 }
 0x494   : > { %1739 = vpow2.f32 %v1111_v52 }
 0x49a   : > { %v1740_v53 = vpop.eup %1739 }
 0x49b   : > { %v1113_v24 = vsel %vm584_vm0, %v1740_v53, 0.0 }
 0x49c   : > { %1114 = vadd.xlane.f32.xlu1 %v1113_v24 }
 0x50f   : > { %v1115_v54 = vpop.xlane.xlu1 %1114 }
 0x510   : > { %1741 = vlog2.f32 %v1115_v54 }
 0x516   : > { %v1742_v29 = vpop.eup %1741 }
 0x517   : > { %v1117_v30 = vmul.f32 0.6931472, %v1742_v29 }
 0x519   : > { %v1118_v56 = vadd.f32 %v1117_v30, %v1109_v50 }
 0x51b   : > { %v1119_v57 = vsub.f32 %v1104_v46, %v1118_v56 }
 0x51d   : > { %v1126_v60 = vsel %vm584_vm0, %v1119_v57, %v1124_v58 }
 0x51e   : > { %v1128_v61 = vsel %vm1127_vm13, %v1126_v60, %v1125_v59 }
 0x51f   : > { %1134 = vst.msk [vmem:[%s244_s29] sm:$0x7] %vm1132_vm14, %v1128_v61 }
 0x520   : > { %1812 = shalt.err (!%p1809_p9)
}
 0x521   : > { %1676 = dma.vmem_to_hbm [thread:$0]  (%p1935_p5), %s1149_s23, 48, %s1151_s24, %s1136_s0  }
 0x522 PF: > { %p1688_p10 = scmp.ge.s32.totalorder %s1853_s28, 2  ;;  %s1162_s19 = sand.u32 1, %s1841_s25  }
 0x523   : > { %s1163_s21 = scalar_lea.sflag [#allocation7], %s1162_s19 }
 0x524   : > { %p1683_p11 = pnand %p1688_p10, %p1939_p6 }
 0x526   : > { %p1684_p12 = pneg %p1683_p11 }
 0x528   : > { %1836 = dma.done.wait (%p1684_p12), %s1163_s21, 48  }
 0x529   : > { %1838 = vsyncadd (%p1684_p12), %s1163_s21, 4294967248  ;;  %p25_p13 = scmp.ge.s32.totalorder %s1922_s30, 8   ;;  %s2093_s25 = smov %s1845_s26 }
 0x52a   : > { %s2094_s26 = smov %s1849_s27  ;;  %s2095_s27 = smov %s1933_s9 }
 0x52b   : > { %s2096_s28 = smov %s1922_s30  ;;  %27 = sbr.rel (!%p25_p13) target bundleno = 10 (0xa), region = 84 }
 0x530   :  { %1169 = vsyncpa [#allocation6], 1 }
 0x531   :  { %1171 = vsyncpa [#allocation6 + $0x1], 1 }
 0x532   :  { %1172 = vsyncpa [#allocation7], 1 }
 0x533   :  { %1174 = vsyncpa [#allocation7 + $0x1], 1 }

</bundles_post_ra>
